<compile_context>
chip_gen: v6e
topology: v6e:2x2x1
jax: 0.10.0
libtpu: 0.0.40
codegen_flags: <defaults>
</compile_context>

<pallas_src>
import functools

import jax
import jax.numpy as jnp
from jax.experimental import pallas as pl
from jax.experimental.pallas import tpu as pltpu


def _inr_kernel(*refs, hidden_layers, use_vpu_first, compute_dtype):
    if hidden_layers > 0:
        x_ref, w1_ref, b1_ref, wh_ref, bh_ref, wo_ref, bo_ref, o_ref = refs
    else:
        x_ref, w1_ref, b1_ref, wo_ref, bo_ref, o_ref = refs
        wh_ref = bh_ref = None

    x = x_ref[...]
    in_f = x.shape[1]
    b1 = b1_ref[...].astype(jnp.float32)          # (1, H)

    if use_vpu_first:
        # K is tiny (e.g. 2): a (TM,K)@(K,H) matmul is ~1% MXU utilization and
        # serializes a full MXU FIFO round-trip with the next layer.  Do it as
        # K broadcast multiply-adds on the VPU instead (MXU slot stays free).
        w1 = w1_ref[...].astype(jnp.float32)      # (in_f, H), loaded once
        h = x[:, 0:1].astype(jnp.float32) * w1[0:1, :] + b1
        for j in range(1, in_f):
            h = h + x[:, j:j + 1].astype(jnp.float32) * w1[j:j + 1, :]
    else:
        h = jnp.dot(x.astype(compute_dtype),
                    w1_ref[...].astype(compute_dtype),
                    preferred_element_type=jnp.float32) + b1
    h = jnp.maximum(h, 0.0)

    # Hidden layers: Linear + ReLU, weights stacked as (L, H, H) bf16,
    # biases (L, 1, H) f32.  bf16 operands, f32 accumulation on the MXU.
    for l in range(hidden_layers):
        h = jnp.dot(h.astype(compute_dtype), wh_ref[l],
                    preferred_element_type=jnp.float32)
        h = jnp.maximum(h + bh_ref[l].astype(jnp.float32), 0.0)

    # Final (outermost) linear, no nonlinearity.
    out = jnp.dot(h.astype(compute_dtype), wo_ref[...],
                  preferred_element_type=jnp.float32)
    o_ref[...] = (out + bo_ref[...].astype(jnp.float32)).astype(o_ref.dtype)


def _choose_row_tile(rows, max_tile=1024, min_tile=128):
    """Row tile: multiple of 8, ideally an exact divisor of `rows` (avoids the
    wrapper-side pad/slice HBM copies), and leaving >= 2 grid steps where
    possible (v7x megacore has 2 TensorCores)."""
    cap = min(max_tile, rows)
    if rows >= 2 * min_tile:
        cap = min(cap, rows // 2)            # keep the grid >= 2 steps
    cap = max(min_tile if rows >= min_tile else 8, (cap // 8) * 8)
    # Prefer an exact divisor within a modest window below the cap.
    t = cap
    lo = max(8, cap - 248)
    while t >= lo:
        if rows % t == 0:
            return t
        t -= 8
    return cap                               # fall back to padding


def inr_forward(coords, params, *, max_row_tile=1024,
                compute_dtype=jnp.bfloat16):
    """coords: (B, N, in_features) float32.  Returns (output, coords)."""
    w1, b1, wh, bh, wo, bo = params
    B, N, in_f = coords.shape
    H = w1.shape[1]
    out_f = wo.shape[1]
    L = wh.shape[0]

    rows = B * N
    row_tile = _choose_row_tile(rows, max_tile=max_row_tile)
    rows_pad = pl.cdiv(rows, row_tile) * row_tile

    x = coords.reshape(rows, in_f)
    if rows_pad != rows:
        x = jnp.pad(x, ((0, rows_pad - rows), (0, 0)))

    use_vpu_first = in_f <= 8  # tiny K -> VPU broadcast-FMA path

    # Cast params once, outside the kernel.  Weights on the MXU path go bf16;
    # biases (and the tiny VPU-path first-layer weights) stay f32.
    w1_k = w1.astype(jnp.float32) if use_vpu_first else w1.astype(compute_dtype)
    b1_2d = b1.reshape(1, H).astype(jnp.float32)
    wo_k = wo.astype(compute_dtype)
    bo_2d = bo.reshape(1, out_f).astype(jnp.float32)

    inputs = [x, w1_k, b1_2d]
    in_specs = [
        pl.BlockSpec((row_tile, in_f), lambda i: (i, 0)),      # x tile
        pl.BlockSpec((in_f, H), lambda i: (0, 0)),              # w1
        pl.BlockSpec((1, H), lambda i: (0, 0)),                 # b1
    ]
    if L > 0:  # guard the hidden_layers == 0 edge case (no 0-sized blocks)
        wh_k = wh.astype(compute_dtype)
        bh_2d = bh.reshape(L, 1, H).astype(jnp.float32)
        inputs += [wh_k, bh_2d]
        in_specs += [
            pl.BlockSpec((L, H, H), lambda i: (0, 0, 0)),       # wh stack
            pl.BlockSpec((L, 1, H), lambda i: (0, 0, 0)),       # bh stack
        ]
    inputs += [wo_k, bo_2d]
    in_specs += [
        pl.BlockSpec((H, out_f), lambda i: (0, 0)),             # wo
        pl.BlockSpec((1, out_f), lambda i: (0, 0)),             # bo
    ]

    kernel = functools.partial(_inr_kernel, hidden_layers=L,
                               use_vpu_first=use_vpu_first,
                               compute_dtype=compute_dtype)

    out_flat = pl.pallas_call(
        kernel,
        out_shape=jax.ShapeDtypeStruct((rows_pad, out_f), jnp.float32),
        grid_spec=pltpu.PrefetchScalarGridSpec(
            num_scalar_prefetch=0,
            grid=(rows_pad // row_tile,),
            in_specs=in_specs,
            out_specs=pl.BlockSpec((row_tile, out_f), lambda i: (i, 0)),
        ),
        compiler_params=pltpu.CompilerParams(
            dimension_semantics=("parallel",)),
    )(*inputs)

    out = out_flat if rows_pad == rows else out_flat[:rows]
    output = out.reshape(B, N, out_f)
    # INR.forward returns (output, coords)  (pos_encode=False => coords unchanged)
    return output, coords


def init_params(key, in_features, hidden_features, hidden_layers, out_features):
    """Deterministic init mimicking nn.Linear default (U(-1/sqrt(fan_in), +))."""
    def linear(key, fan_in, fan_out):
        kw, kb = jax.random.split(key)
        bound = 1.0 / jnp.sqrt(fan_in)
        w = jax.random.uniform(kw, (fan_in, fan_out), jnp.float32, -bound, bound)
        b = jax.random.uniform(kb, (fan_out,), jnp.float32, -bound, bound)
        return w, b

    keys = jax.random.split(key, hidden_layers + 2)
    w1, b1 = linear(keys[0], in_features, hidden_features)
    whs, bhs = [], []
    for l in range(hidden_layers):
        w, b = linear(keys[1 + l], hidden_features, hidden_features)
        whs.append(w)
        bhs.append(b)
    wh = jnp.stack(whs, axis=0) if hidden_layers > 0 else \
        jnp.zeros((0, hidden_features, hidden_features), jnp.float32)
    bh = jnp.stack(bhs, axis=0) if hidden_layers > 0 else \
        jnp.zeros((0, hidden_features), jnp.float32)
    wo, bo = linear(keys[-1], hidden_features, out_features)
    return (w1, b1, wh, bh, wo, bo)


def inr_reference(coords, params):
    """Pure-JAX f32 reference of the same forward pass."""
    w1, b1, wh, bh, wo, bo = params
    h = jnp.maximum(coords @ w1 + b1, 0.0)
    for l in range(wh.shape[0]):
        h = jnp.maximum(h @ wh[l] + bh[l], 0.0)
    return h @ wo + bo


if __name__ == "__main__":
    # Small shapes: batch=2, N=256 coordinates, in_features=2, hidden=32,
    # hidden_layers=2, out_features=3.
    key = jax.random.PRNGKey(0)
    k_x, k_p = jax.random.split(key)

    B, N, IN_F = 2, 256, 2
    HIDDEN, LAYERS, OUT_F = 32, 2, 3

    coords = jax.random.uniform(k_x, (B, N, IN_F), jnp.float32, -1.0, 1.0)
    params = init_params(k_p, IN_F, HIDDEN, LAYERS, OUT_F)

    out, coords_out = inr_forward(coords, params)
    out = jax.block_until_ready(out)
    coords_out = jax.block_until_ready(coords_out)

    ref = inr_reference(coords, params)
    assert out.shape == (B, N, OUT_F)
    assert coords_out.shape == coords.shape
    # bf16 weights/activations with f32 accumulation -> loosened tolerance
    # vs the pure-f32 reference.
    assert jnp.allclose(out, ref, atol=3e-2, rtol=3e-2), \
        f"max err {jnp.max(jnp.abs(out - ref))}"

    # TODO(synk): pos_encode=True path (NeRF PosEncoding) not implemented; the
    # module default is pos_encode=False which is what this kernel reproduces.
    print("KERNEL_OK")
</pallas_src>

<mosaic_0001>
module attributes {stable_mosaic.version = 11 : i64} {
  func.func @_inr_kernel(%arg0: i32, %arg1: memref<256x2xf32, #tpu.memory_space<vmem>>, %arg2: memref<2x32xf32, #tpu.memory_space<vmem>>, %arg3: memref<1x32xf32, #tpu.memory_space<vmem>>, %arg4: memref<2x32x32xbf16, #tpu.memory_space<vmem>>, %arg5: memref<2x1x32xf32, #tpu.memory_space<vmem>>, %arg6: memref<32x3xbf16, #tpu.memory_space<vmem>>, %arg7: memref<1x3xf32, #tpu.memory_space<vmem>>, %arg8: memref<256x3xf32, #tpu.memory_space<vmem>>) attributes {dimension_semantics = [#tpu.dimension_semantics<parallel>], iteration_bounds = array<i64: 2>, scalar_prefetch = 0 : i64, scratch_operands = 0 : i64, tpu.core_type = #tpu.core_type<tc>, window_params = [{transform_indices = @transform_0, window_bounds = array<i64: 256, 2>}, {pipeline_mode = #tpu.pipeline_mode<synchronous>, transform_indices = @transform_1, window_bounds = array<i64: 2, 32>}, {pipeline_mode = #tpu.pipeline_mode<synchronous>, transform_indices = @transform_2, window_bounds = array<i64: 1, 32>}, {pipeline_mode = #tpu.pipeline_mode<synchronous>, transform_indices = @transform_3, window_bounds = array<i64: 2, 32, 32>}, {pipeline_mode = #tpu.pipeline_mode<synchronous>, transform_indices = @transform_4, window_bounds = array<i64: 2, 1, 32>}, {pipeline_mode = #tpu.pipeline_mode<synchronous>, transform_indices = @transform_5, window_bounds = array<i64: 32, 3>}, {pipeline_mode = #tpu.pipeline_mode<synchronous>, transform_indices = @transform_6, window_bounds = array<i64: 1, 3>}, {transform_indices = @transform_7, window_bounds = array<i64: 256, 3>}]} {
    %c0 = arith.constant 0 : index
    %c0_0 = arith.constant 0 : index
    %0 = vector.load %arg1[%c0, %c0_0] : memref<256x2xf32, #tpu.memory_space<vmem>>, vector<256x2xf32>
    %c0_1 = arith.constant 0 : index
    %c0_2 = arith.constant 0 : index
    %1 = vector.load %arg3[%c0_1, %c0_2] : memref<1x32xf32, #tpu.memory_space<vmem>>, vector<1x32xf32>
    %c0_3 = arith.constant 0 : index
    %c0_4 = arith.constant 0 : index
    %2 = vector.load %arg2[%c0_3, %c0_4] : memref<2x32xf32, #tpu.memory_space<vmem>>, vector<2x32xf32>
    %3 = vector.extract_strided_slice %0 {offsets = [0, 0], sizes = [256, 1], strides = [1, 1]} : vector<256x2xf32> to vector<256x1xf32>
    %4 = vector.extract_strided_slice %2 {offsets = [0, 0], sizes = [1, 32], strides = [1, 1]} : vector<2x32xf32> to vector<1x32xf32>
    %5 = vector.broadcast %3 : vector<256x1xf32> to vector<256x32xf32>
    %6 = vector.broadcast %4 : vector<1x32xf32> to vector<256x32xf32>
    %7 = arith.mulf %5, %6 : vector<256x32xf32>
    %8 = vector.broadcast %1 : vector<1x32xf32> to vector<256x32xf32>
    %9 = arith.addf %7, %8 : vector<256x32xf32>
    %10 = vector.extract_strided_slice %0 {offsets = [0, 1], sizes = [256, 1], strides = [1, 1]} : vector<256x2xf32> to vector<256x1xf32>
    %11 = vector.extract_strided_slice %2 {offsets = [1, 0], sizes = [1, 32], strides = [1, 1]} : vector<2x32xf32> to vector<1x32xf32>
    %12 = vector.broadcast %10 : vector<256x1xf32> to vector<256x32xf32>
    %13 = vector.broadcast %11 : vector<1x32xf32> to vector<256x32xf32>
    %14 = arith.mulf %12, %13 : vector<256x32xf32>
    %15 = arith.addf %9, %14 : vector<256x32xf32>
    %cst = arith.constant 0.000000e+00 : f32
    %16 = vector.broadcast %cst : f32 to vector<256x32xf32>
    %17 = arith.maximumf %15, %16 : vector<256x32xf32>
    %18 = arith.truncf %17 : vector<256x32xf32> to vector<256x32xbf16>
    %c0_5 = arith.constant 0 : index
    %c0_6 = arith.constant 0 : index
    %c0_7 = arith.constant 0 : index
    %19 = vector.load %arg4[%c0_5, %c0_6, %c0_7] : memref<2x32x32xbf16, #tpu.memory_space<vmem>>, vector<1x32x32xbf16>
    %20 = vector.shape_cast %19 : vector<1x32x32xbf16> to vector<32x32xbf16>
    %cst_8 = arith.constant dense<0.000000e+00> : vector<256x32xf32>
    %21 = tpu.matmul %18, %20, %cst_8 {dimension_numbers = #tpu.dot_dimension_numbers<[1], [0], [0], [1], [0, 0, 1, 1], [], []>} : vector<256x32xbf16>, vector<32x32xbf16>, vector<256x32xf32> -> vector<256x32xf32>
    %c0_9 = arith.constant 0 : index
    %c0_10 = arith.constant 0 : index
    %c0_11 = arith.constant 0 : index
    %22 = vector.load %arg5[%c0_9, %c0_10, %c0_11] : memref<2x1x32xf32, #tpu.memory_space<vmem>>, vector<1x1x32xf32>
    %23 = vector.shape_cast %22 : vector<1x1x32xf32> to vector<1x32xf32>
    %24 = vector.broadcast %23 : vector<1x32xf32> to vector<256x32xf32>
    %25 = arith.addf %21, %24 : vector<256x32xf32>
    %cst_12 = arith.constant 0.000000e+00 : f32
    %26 = vector.broadcast %cst_12 : f32 to vector<256x32xf32>
    %27 = arith.maximumf %25, %26 : vector<256x32xf32>
    %28 = arith.truncf %27 : vector<256x32xf32> to vector<256x32xbf16>
    %c1 = arith.constant 1 : index
    %c0_13 = arith.constant 0 : index
    %c0_14 = arith.constant 0 : index
    %29 = vector.load %arg4[%c1, %c0_13, %c0_14] : memref<2x32x32xbf16, #tpu.memory_space<vmem>>, vector<1x32x32xbf16>
    %30 = vector.shape_cast %29 : vector<1x32x32xbf16> to vector<32x32xbf16>
    %cst_15 = arith.constant dense<0.000000e+00> : vector<256x32xf32>
    %31 = tpu.matmul %28, %30, %cst_15 {dimension_numbers = #tpu.dot_dimension_numbers<[1], [0], [0], [1], [0, 0, 1, 1], [], []>} : vector<256x32xbf16>, vector<32x32xbf16>, vector<256x32xf32> -> vector<256x32xf32>
    %c1_16 = arith.constant 1 : index
    %c0_17 = arith.constant 0 : index
    %c0_18 = arith.constant 0 : index
    %32 = vector.load %arg5[%c1_16, %c0_17, %c0_18] : memref<2x1x32xf32, #tpu.memory_space<vmem>>, vector<1x1x32xf32>
    %33 = vector.shape_cast %32 : vector<1x1x32xf32> to vector<1x32xf32>
    %34 = vector.broadcast %33 : vector<1x32xf32> to vector<256x32xf32>
    %35 = arith.addf %31, %34 : vector<256x32xf32>
    %cst_19 = arith.constant 0.000000e+00 : f32
    %36 = vector.broadcast %cst_19 : f32 to vector<256x32xf32>
    %37 = arith.maximumf %35, %36 : vector<256x32xf32>
    %38 = arith.truncf %37 : vector<256x32xf32> to vector<256x32xbf16>
    %c0_20 = arith.constant 0 : index
    %c0_21 = arith.constant 0 : index
    %39 = vector.load %arg6[%c0_20, %c0_21] : memref<32x3xbf16, #tpu.memory_space<vmem>>, vector<32x3xbf16>
    %cst_22 = arith.constant dense<0.000000e+00> : vector<256x3xf32>
    %40 = tpu.matmul %38, %39, %cst_22 {dimension_numbers = #tpu.dot_dimension_numbers<[1], [0], [0], [1], [0, 0, 1, 1], [], []>} : vector<256x32xbf16>, vector<32x3xbf16>, vector<256x3xf32> -> vector<256x3xf32>
    %c0_23 = arith.constant 0 : index
    %c0_24 = arith.constant 0 : index
    %41 = vector.load %arg7[%c0_23, %c0_24] : memref<1x3xf32, #tpu.memory_space<vmem>>, vector<1x3xf32>
    %42 = vector.broadcast %41 : vector<1x3xf32> to vector<256x3xf32>
    %43 = arith.addf %40, %42 : vector<256x3xf32>
    %c0_25 = arith.constant 0 : index
    %c0_26 = arith.constant 0 : index
    %44 = vector.load %arg8[%c0_25, %c0_26] : memref<256x3xf32, #tpu.memory_space<vmem>>, vector<256x3xf32>
    tpu.vector_store %arg8[%c0_25, %c0_26], %43 {strides = array<i32>} : memref<256x3xf32, #tpu.memory_space<vmem>>, vector<256x3xf32>,
    return
  }
  func.func @transform_0(%arg0: i32) -> (i32, i32) {
    %c0_i32 = arith.constant 0 : i32
    %c0_i32_0 = arith.constant 0 : i32
    return %arg0, %c0_i32 : i32, i32
  }
  func.func @transform_1(%arg0: i32) -> (i32, i32) {
    %c0_i32 = arith.constant 0 : i32
    %c0_i32_0 = arith.constant 0 : i32
    %c0_i32_1 = arith.constant 0 : i32
    return %c0_i32, %c0_i32_0 : i32, i32
  }
  func.func @transform_2(%arg0: i32) -> (i32, i32) {
    %c0_i32 = arith.constant 0 : i32
    %c0_i32_0 = arith.constant 0 : i32
    %c0_i32_1 = arith.constant 0 : i32
    return %c0_i32, %c0_i32_0 : i32, i32
  }
  func.func @transform_3(%arg0: i32) -> (i32, i32, i32) {
    %c0_i32 = arith.constant 0 : i32
    %c0_i32_0 = arith.constant 0 : i32
    %c0_i32_1 = arith.constant 0 : i32
    %c0_i32_2 = arith.constant 0 : i32
    return %c0_i32, %c0_i32_0, %c0_i32_1 : i32, i32, i32
  }
  func.func @transform_4(%arg0: i32) -> (i32, i32, i32) {
    %c0_i32 = arith.constant 0 : i32
    %c0_i32_0 = arith.constant 0 : i32
    %c0_i32_1 = arith.constant 0 : i32
    %c0_i32_2 = arith.constant 0 : i32
    return %c0_i32, %c0_i32_0, %c0_i32_1 : i32, i32, i32
  }
  func.func @transform_5(%arg0: i32) -> (i32, i32) {
    %c0_i32 = arith.constant 0 : i32
    %c0_i32_0 = arith.constant 0 : i32
    %c0_i32_1 = arith.constant 0 : i32
    return %c0_i32, %c0_i32_0 : i32, i32
  }
  func.func @transform_6(%arg0: i32) -> (i32, i32) {
    %c0_i32 = arith.constant 0 : i32
    %c0_i32_0 = arith.constant 0 : i32
    %c0_i32_1 = arith.constant 0 : i32
    return %c0_i32, %c0_i32_0 : i32, i32
  }
  func.func @transform_7(%arg0: i32) -> (i32, i32) {
    %c0_i32 = arith.constant 0 : i32
    %c0_i32_0 = arith.constant 0 : i32
    return %arg0, %c0_i32 : i32, i32
  }
}

</mosaic_0001>

<bundles_post_ra>
// kernel: tpu_custom_call.1
= control target key start
LH: loop header
LB: loop body
LE: loop exit
PB: predicated region body
PF: predicated region fallthrough
CT: control target
= control target key end

     0   :  { %s2003_s24 = smov 0   ;;  %s2464_s0 = inlined_call_operand.vmem [shape: f32[512,2], index: 0, kind: input, shape index: {}]   ;;  %s2465_s1 = inlined_call_operand.vmem [shape: f32[2,32], index: 1, kind: input, shape index: {}]   ;;  %s2466_s2 = inlined_call_operand.vmem [shape: f32[1,32], index: 2, kind: input, shape index: {}]   ;;  %s2467_s3 = inlined_call_operand.vmem [shape: bf16[2,32,32], index: 3, kind: input, shape index: {}]   ;;  %s2468_s4 = inlined_call_operand.vmem [shape: f32[2,1,32], index: 4, kind: input, shape index: {}]   ;;  %s2469_s5 = inlined_call_operand.vmem [shape: bf16[32,3], index: 5, kind: input, shape index: {}]   ;;  %s2470_s6 = inlined_call_operand.vmem [shape: f32[1,3], index: 6, kind: input, shape index: {}]   ;;  %s2471_s7 = inlined_call_operand.vmem [shape: f32[512,3], index: 7, kind: output, shape index: {}]  }
   0x1 LB: > { %s1679_s25 = sadd.s32 4294967295, %s1959_s24   ;;  %p1683_p0 = scmp.ge.s32.totalorder %s1959_s24, 1  ;;  %s1959_s24 = sphi %s2003_s24, %s17_s24  }
   0x2   : > { %p238_p1 = scmp.lt.s32.totalorder %s1959_s24, 3 }
   0x4   : > { %p239_p2 = pnand %p1683_p0, %p238_p1 }
   0x5   : > { %s1684_s26 = sshll.u32 (!%p239_p2), %s1679_s25, 5 }
   0x6   : > { %242 = sbr.rel (%p239_p2) target bundleno = 928 (0x3a0), region = 48  ;;  %p271_p3 = scmp.lt.s32.totalorder (!%p239_p2), %s1684_s26, 63 }
   0xb   : > { %v1961_v0 = vmov 0   ;;  %s2473_s26 = smov (!%p271_p3, %s1684_s26), 63  ;;  %v1962_v6 = vmov 1   ;;  %v1947_v16 = vld [vmem:[%s2467_s3 + $0x8] sm:$0xff]   ;;  %v1948_v18 = vld [vmem:[%s2467_s3] sm:$0xff]   ;;  %v477_v43 = vlaneseq  ;;  %vm818_vm0 = vcmask 261120  }
   0xc   : > { %1930 = vset.pattern.permute.xlu1 %v1961_v0  ;;  %1929 = vset.pattern.permute.xlu0 %v1961_v0  ;;  %s1685_s27 = sshll.u32 %s2473_s26, 3  ;;  %v316_v50 = vld [vmem:[%s2465_s1] sm:$0x3]  ;;  %vm1590_vm1 = vcmask 23552  }
   0xd   : > { %s2021_s30 = scalar_lea.vmem %s2464_s0, %s1685_s27  ;;  %1807 = vmatprep.subr.bf16.mxu0 %v1947_v16  ;;  %1915 = vmatprep.subr.bf16.mxu1 %v1947_v16  ;;  %v478_v46 = vshrl.u32 %v477_v43, 7  ;;  %v2112_v60 = vld [vmem:[%s2466_s2] ss:$0 sm:$0xff]  ;;  %s2363_s12 = scalar_lea.vmem %s2471_s7, %s1685_s27 }
   0xe   : > { %v285_v1 = vld [vmem:[%s2021_s30 + $0x10] sm:$0xff]  ;;  %v283_v2 = vld [vmem:[%s2021_s30] sm:$0xff]  ;;  %v286_v3 = vld [vmem:[%s2021_s30 + $0x18] sm:$0xff]  ;;  %1808 = vmatpush3.bf16.msra.mxu0 %v1947_v16  ;;  %1917 = vmatpush3.bf16.msra.mxu1 %v1947_v16 }
   0xf   : > { %329 = vperm.xlu1 %1930, %v285_v1   ;;  %319 = vperm.xlu0 %1929, %v283_v2   ;;  %v284_v4 = vld [vmem:[%s2021_s30 + $0x8] sm:$0xff]  ;;  %v287_v9 = vld [vmem:[%s2021_s30 + $0x20] sm:$0xff]  ;;  %v289_v11 = vld [vmem:[%s2021_s30 + $0x30] sm:$0xff]  ;;  %v479_v49 = vsub.s32 0, %v478_v46  ;;  %v681_v52 = vsub.s32 1, %v478_v46 }
  0x10   : > { %v288_v5 = vld [vmem:[%s2021_s30 + $0x28] sm:$0xff]  ;;  %v290_v13 = vld [vmem:[%s2021_s30 + $0x38] sm:$0xff]  ;;  %v291_v17 = vld [vmem:[%s2021_s30 + $0x40] sm:$0xff]  ;;  %1809 = vmatprep.subr.bf16.mxu0 %v1948_v18  ;;  %1916 = vmatprep.subr.bf16.mxu1 %v1948_v18 }
  0x11   : > { %v292_v7 = vld [vmem:[%s2021_s30 + $0x48] sm:$0xff]  ;;  %v293_v19 = vld [vmem:[%s2021_s30 + $0x50] sm:$0xff]  ;;  %v294_v20 = vld [vmem:[%s2021_s30 + $0x58] sm:$0xff]  ;;  %v2101_v54 = vrot.slane %v316_v50, %v479_v49  ;;  %v2107_v58 = vrot.slane %v316_v50, %v681_v52 }
  0x12   : > { %v296_v8 = vld [vmem:[%s2021_s30 + $0x68] sm:$0xff]  ;;  %1810 = vmatpush3.bf16.msra.mxu0 %v1948_v18  ;;  %1918 = vmatpush3.bf16.msra.mxu1 %v1948_v18  ;;  %v295_v21 = vld [vmem:[%s2021_s30 + $0x60] sm:$0xff]  ;;  %v297_v22 = vld [vmem:[%s2021_s30 + $0x70] sm:$0xff] }
  0x13   : > { %334 = vperm.xlu1 %1930, %v286_v3   ;;  %324 = vperm.xlu0 %1929, %v284_v4   ;;  %v2034_v10 = vld [vmem:[%s2021_s30 + $0x88] sm:$0xff]  ;;  %v298_v23 = vld [vmem:[%s2021_s30 + $0x78] sm:$0xff]  ;;  %v299_v24 = vld [vmem:[%s2021_s30 + $0x80] sm:$0xff] }
  0x14   : > { %v2039_v12 = vld [vmem:[%s2021_s30 + $0xa8] sm:$0xff]  ;;  %v302_v25 = vld [vmem:[%s2021_s30 + $0x98] sm:$0xff]  ;;  %v303_v26 = vld [vmem:[%s2021_s30 + $0xa0] sm:$0xff] }
  0x15   : > { %v2044_v14 = vld [vmem:[%s2021_s30 + $0xc8] sm:$0xff]  ;;  %v306_v27 = vld [vmem:[%s2021_s30 + $0xb8] sm:$0xff]  ;;  %v307_v28 = vld [vmem:[%s2021_s30 + $0xc0] sm:$0xff] }
  0x16   : > { %v2048_v15 = vld [vmem:[%s2021_s30 + $0xe8] sm:$0xff]  ;;  %v301_v29 = vld [vmem:[%s2021_s30 + $0x90] sm:$0xff]  ;;  %v310_v30 = vld [vmem:[%s2021_s30 + $0xd8] sm:$0xff] }
  0x17   : > { %1931 = vset.pattern.permute.xlu1 %v1962_v6  ;;  %344 = vperm.xlu0 %1929, %v288_v5   ;;  %v311_v31 = vld [vmem:[%s2021_s30 + $0xe0] sm:$0xff]  ;;  %v314_v32 = vld [vmem:[%s2021_s30 + $0xf8] sm:$0xff]  ;;  %v305_v33 = vld [vmem:[%s2021_s30 + $0xb0] sm:$0xff] }
  0x18   : > { %556 = vperm.xlu1 %1931, %v284_v4   ;;  %v309_v38 = vld [vmem:[%s2021_s30 + $0xd0] sm:$0xff] }
  0x19   : > { %v313_v56 = vld [vmem:[%s2021_s30 + $0xf0] sm:$0xff] }
  0x1b   : > { %364 = vperm.xlu0 %1929, %v292_v7  }
  0x1c   : > { %560 = vperm.xlu1 %1931, %v285_v1  }
  0x1f   : > { %384 = vperm.xlu0 %1929, %v296_v8  }
  0x20   : > { %1932 = vset.pattern.permute.xlu1 %v1961_v0 }
  0x21   : > { %339 = vperm.xlu1 %1932, %v287_v9  }
  0x23   : > { %404 = vperm.xlu0 %1929, %v2034_v10  }
  0x25   : > { %349 = vperm.xlu1 %1932, %v289_v11  }
  0x27   : > { %424 = vperm.xlu0 %1929, %v2039_v12  }
  0x29   : > { %354 = vperm.xlu1 %1932, %v290_v13  }
  0x2b   : > { %444 = vperm.xlu0 %1929, %v2044_v14  }
  0x2d   : > { %1933 = vset.pattern.permute.xlu1 %v1962_v6 }
  0x2e   : > { %572 = vperm.xlu1 %1933, %v288_v5  }
  0x2f   : > { %464 = vperm.xlu0 %1929, %v2048_v15  }
  0x32   : > { %576 = vperm.xlu1 %1933, %v289_v11  }
  0x33   : > { %1945 = vset.pattern.permute.xlu0 %v1962_v6 }
  0x34   : > { %552 = vperm.xlu0 %1945, %v283_v2  }
  0x36   : > { %1934 = vset.pattern.permute.xlu1 %v1961_v0 }
  0x37   : > { %359 = vperm.xlu1 %1934, %v291_v17  }
  0x38   : > { %564 = vperm.xlu0 %1945, %v286_v3  }
  0x3b   : > { %369 = vperm.xlu1 %1934, %v293_v19  }
  0x3c   : > { %568 = vperm.xlu0 %1945, %v287_v9  }
  0x3f   : > { %374 = vperm.xlu1 %1934, %v294_v20  }
  0x40   : > { %580 = vperm.xlu0 %1945, %v290_v13  }
  0x43   : > { %1935 = vset.pattern.permute.xlu1 %v1962_v6 }
  0x44   : > { %588 = vperm.xlu1 %1935, %v292_v7   ;;  %584 = vperm.xlu0 %1945, %v291_v17  }
  0x48   : > { %592 = vperm.xlu1 %1935, %v293_v19   ;;  %596 = vperm.xlu0 %1945, %v294_v20  }
  0x4c   : > { %1936 = vset.pattern.permute.xlu1 %v1961_v0  ;;  %600 = vperm.xlu0 %1945, %v295_v21  }
  0x4d   : > { %379 = vperm.xlu1 %1936, %v295_v21  }
  0x50   : > { %612 = vperm.xlu0 %1945, %v298_v23  }
  0x51   : > { %389 = vperm.xlu1 %1936, %v297_v22  }
  0x54   : > { %616 = vperm.xlu0 %1945, %v299_v24  }
  0x55   : > { %394 = vperm.xlu1 %1936, %v298_v23  }
  0x58   : > { %628 = vperm.xlu0 %1945, %v302_v25  }
  0x59   : > { %1937 = vset.pattern.permute.xlu1 %v1962_v6 }
  0x5a   : > { %604 = vperm.xlu1 %1937, %v296_v8  }
  0x5c   : > { %632 = vperm.xlu0 %1945, %v303_v26  }
  0x5e   : > { %608 = vperm.xlu1 %1937, %v297_v22  }
  0x60   : > { %644 = vperm.xlu0 %1945, %v306_v27  }
  0x62   : > { %1938 = vset.pattern.permute.xlu1 %v1961_v0 }
  0x63   : > { %399 = vperm.xlu1 %1938, %v299_v24  }
  0x64   : > { %648 = vperm.xlu0 %1945, %v307_v28  }
  0x67   : > { %409 = vperm.xlu1 %1938, %v301_v29  }
  0x68   : > { %660 = vperm.xlu0 %1945, %v310_v30  }
  0x6b   : > { %414 = vperm.xlu1 %1938, %v302_v25  }
  0x6c   : > { %664 = vperm.xlu0 %1945, %v311_v31  }
  0x6f   : > { %1939 = vset.pattern.permute.xlu1 %v1962_v6 }
  0x70   : > { %620 = vperm.xlu1 %1939, %v2034_v10   ;;  %676 = vperm.xlu0 %1945, %v314_v32  }
  0x74   : > { %624 = vperm.xlu1 %1939, %v301_v29  }
  0x78   : > { %1940 = vset.pattern.permute.xlu1 %v1961_v0 }
  0x79   : > { %419 = vperm.xlu1 %1940, %v303_v26  }
  0x7d   : > { %429 = vperm.xlu1 %1940, %v305_v33  }
  0x81   : > { %434 = vperm.xlu1 %1940, %v306_v27  }
  0x85   : > { %1941 = vset.pattern.permute.xlu1 %v1962_v6 }
  0x86   : > { %636 = vperm.xlu1 %1941, %v2039_v12  }
  0x8a   : > { %v330_v34 = vpop.permute.xlu1 %329  ;;  %640 = vperm.xlu1 %1941, %v305_v33   ;;  %v320_v35 = vpop.permute.xlu0 %319 }
  0x8b   : > { %v481_v61 = vmul.f32 %v2101_v54, %v320_v35  ;;  %v483_v1 = vmul.f32 %v2101_v54, %v330_v34 }
  0x8d   : > { %v519_v3 = vadd.f32 %v2112_v60, %v481_v61  ;;  %v521_v11 = vadd.f32 %v2112_v60, %v483_v1 }
  0x8e   : > { %v335_v36 = vpop.permute.xlu1 %334  ;;  %1942 = vset.pattern.permute.xlu1 %v1961_v0  ;;  %v325_v37 = vpop.permute.xlu0 %324 }
  0x8f   : > { %439 = vperm.xlu1 %1942, %v307_v28   ;;  %v482_v57 = vmul.f32 %v2101_v54, %v325_v37  ;;  %v484_v4 = vmul.f32 %v2101_v54, %v335_v36 }
  0x91   : > { %v520_v63 = vadd.f32 %v2112_v60, %v482_v57 }
  0x92   : > { %v345_v39 = vpop.permute.xlu0 %344 }
  0x93   : > { %449 = vperm.xlu1 %1942, %v309_v38   ;;  %v557_v40 = vpop.permute.xlu1 %556  ;;  %v486_v7 = vmul.f32 %v2101_v54, %v345_v39 }
  0x95   : > { %v524_v17 = vadd.f32 %v2112_v60, %v486_v7 }
  0x96   : > { %v2087_v41 = vpop.permute.xlu0 %364 }
  0x97   : > { %454 = vperm.xlu1 %1942, %v310_v30   ;;  %v561_v42 = vpop.permute.xlu1 %560  ;;  %v490_v35 = vmul.f32 %v2101_v54, %v2087_v41 }
  0x98   : > { %v685_v8 = vmul.f32 %v2107_v58, %v561_v42 }
  0x99   : > { %v528_v49 = vadd.f32 %v2112_v60, %v490_v35 }
  0x9a   : > { %v2089_v44 = vpop.permute.xlu0 %384  ;;  %v717_v18 = vadd.f32 %v685_v8, %v521_v11 }
  0x9b   : > { %1943 = vset.pattern.permute.xlu1 %v1962_v6 }
  0x9c   : > { %652 = vperm.xlu1 %1943, %v2044_v14   ;;  %v340_v45 = vpop.permute.xlu1 %339  ;;  %v522_v14 = vadd.f32 %v2112_v60, %v484_v4  ;;  %v749_v26 = vmax.f32 %v717_v18, 0.0 }
  0x9d   : > { %v485_v20 = vmul.f32 %v2101_v54, %v340_v45 }
  0x9e   : > { %v2093_v47 = vpop.permute.xlu0 %404 }
  0x9f   : > { %v523_v30 = vadd.f32 %v2112_v60, %v485_v20 }
  0xa0   : > { %656 = vperm.xlu1 %1943, %v309_v38   ;;  %v350_v48 = vpop.permute.xlu1 %349 }
  0xa2   : > { %v2098_v51 = vpop.permute.xlu0 %424 }
  0xa4   : > { %1944 = vset.pattern.permute.xlu1 %v1961_v0  ;;  %v355_v53 = vpop.permute.xlu1 %354  ;;  %v684_v0 = vmul.f32 %v2107_v58, %v557_v40 }
  0xa5   : > { %459 = vperm.xlu1 %1944, %v311_v31   ;;  %v488_v27 = vmul.f32 %v2101_v54, %v355_v53 }
  0xa6   : > { %v2103_v55 = vpop.permute.xlu0 %444  ;;  %v716_v5 = vadd.f32 %v684_v0, %v520_v63 }
  0xa7   : > { %v526_v39 = vadd.f32 %v2112_v60, %v488_v27 }
  0xa8   : > { %v748_v16 = vmax.f32 %v716_v5, 0.0 }
  0xa9   : > { %469 = vperm.xlu1 %1944, %v313_v56   ;;  %v573_v59 = vpop.permute.xlu1 %572 }
  0xaa   : > { %v2115_v62 = vpop.permute.xlu0 %464  ;;  %v688_v21 = vmul.f32 %v2107_v58, %v573_v59 }
  0xac   : > { %v720_v31 = vadd.f32 %v688_v21, %v524_v17 }
  0xad   : > { %474 = vperm.xlu1 %1944, %v314_v32   ;;  %v577_v2 = vpop.permute.xlu1 %576 }
  0xae   : > { %v689_v28 = vmul.f32 %v2107_v58, %v577_v2  ;;  %v752_v43 = vmax.f32 %v720_v31, 0.0 }
  0xaf   : > { %v553_v9 = vpop.permute.xlu0 %552 }
  0xb0   : > { %v683_v10 = vmul.f32 %v2107_v58, %v553_v9 }
  0xb1   : > { %1946 = vset.pattern.permute.xlu1 %v1962_v6  ;;  %v487_v6 = vmul.f32 %v2101_v54, %v350_v48 }
  0xb2   : > { %v715_v12 = vadd.f32 %v683_v10, %v519_v3  ;;  %668 = vperm.xlu1 %1946, %v2048_v15   ;;  %v360_v13 = vpop.permute.xlu1 %359 }
  0xb3   : > { %v565_v19 = vpop.permute.xlu0 %564  ;;  %v525_v34 = vadd.f32 %v2112_v60, %v487_v6  ;;  %v489_v45 = vmul.f32 %v2101_v54, %v360_v13 }
  0xb4   : > { %v747_v22 = vmax.f32 %v715_v12, 0.0  ;;  %v686_v23 = vmul.f32 %v2107_v58, %v565_v19 }
  0xb5   : > { %v721_v40 = vadd.f32 %v689_v28, %v525_v34  ;;  %v527_v61 = vadd.f32 %v2112_v60, %v489_v45 }
  0xb6   : > { %v718_v24 = vadd.f32 %v686_v23, %v522_v14  ;;  %672 = vperm.xlu1 %1946, %v313_v56   ;;  %v370_v15 = vpop.permute.xlu1 %369  ;;  %v779_v25 = vpack.c.bf16 %v748_v16, %v747_v22 }
  0xb7   : > { %v569_v29 = vpop.permute.xlu0 %568  ;;  %v753_v41 = vmax.f32 %v721_v40, 0.0  ;;  %v491_v53 = vmul.f32 %v2101_v54, %v370_v15  ;;  %v494_v15 = vmul.f32 %v2101_v54, %v2089_v44 }
  0xb8   : > { %v750_v32 = vmax.f32 %v718_v24, 0.0  ;;  %v687_v33 = vmul.f32 %v2107_v58, %v569_v29  ;;  %1811 = vmatprep.mubr.msk.bf16.mxu0 %vm818_vm0, %v779_v25 }
  0xb9   : > { %v529_v5 = vadd.f32 %v2112_v60, %v491_v53  ;;  %v532_v29 = vadd.f32 %v2112_v60, %v494_v15 }
  0xba   : > { %v780_v36 = vpack.c.bf16 %v750_v32, %v749_v26  ;;  %v719_v37 = vadd.f32 %v687_v33, %v523_v30  ;;  %v375_v38 = vpop.permute.xlu1 %374 }
  0xbb   : > { %v581_v42 = vpop.permute.xlu0 %580  ;;  %v492_v56 = vmul.f32 %v2101_v54, %v375_v38 }
  0xbc   : > { %v751_v46 = vmax.f32 %v719_v37, 0.0  ;;  %v690_v48 = vmul.f32 %v2107_v58, %v581_v42  ;;  %1812 = vmatmul.mubr.msk.bf16.vlgmr.msra.gmra.mxu0 %vm818_vm0, %v780_v36 }
  0xbd   : > { %v530_v7 = vadd.f32 %v2112_v60, %v492_v56 }
  0xbe   : > { %v781_v50 = vpack.c.bf16 %v752_v43, %v751_v46  ;;  %v722_v52 = vadd.f32 %v690_v48, %v526_v39 }
  0xbf   : > { %v589_v57 = vpop.permute.xlu1 %588  ;;  %v585_v59 = vpop.permute.xlu0 %584 }
  0xc0   : > { %v754_v63 = vmax.f32 %v722_v52, 0.0  ;;  %v692_v0 = vmul.f32 %v2107_v58, %v589_v57  ;;  %v691_v1 = vmul.f32 %v2107_v58, %v585_v59  ;;  %1815 = vmatprep.mubr.msk.bf16.mxu0 %vm818_vm0, %v781_v50  ;;  %v498_v57 = vmul.f32 %v2101_v54, %v2093_v47 }
  0xc2   : > { %v782_v2 = vpack.c.bf16 %v754_v63, %v753_v41  ;;  %v724_v3 = vadd.f32 %v692_v0, %v528_v49  ;;  %v723_v4 = vadd.f32 %v691_v1, %v527_v61  ;;  %v536_v0 = vadd.f32 %v2112_v60, %v498_v57 }
  0xc3   : > { %v593_v8 = vpop.permute.xlu1 %592  ;;  %v597_v9 = vpop.permute.xlu0 %596 }
  0xc4   : > { %v756_v10 = vmax.f32 %v724_v3, 0.0  ;;  %v755_v11 = vmax.f32 %v723_v4, 0.0  ;;  %v693_v12 = vmul.f32 %v2107_v58, %v593_v8  ;;  %v694_v13 = vmul.f32 %v2107_v58, %v597_v9  ;;  %1816 = vmatmul.mubr.msk.bf16.gmra.mxu0 %vm818_vm0, %v782_v2 }
  0xc6   : > { %v783_v14 = vpack.c.bf16 %v756_v10, %v755_v11  ;;  %v725_v16 = vadd.f32 %v693_v12, %v529_v5  ;;  %v726_v17 = vadd.f32 %v694_v13, %v530_v7 }
  0xc7   : > { %v601_v6 = vpop.permute.xlu0 %600 }
  0xc8   : > { %v757_v18 = vmax.f32 %v725_v16, 0.0  ;;  %v758_v19 = vmax.f32 %v726_v17, 0.0  ;;  %v380_v20 = vpop.permute.xlu1 %379  ;;  %1819 = vmatprep.mubr.msk.bf16.mxu0 %vm818_vm0, %v783_v14  ;;  %v695_v26 = vmul.f32 %v2107_v58, %v601_v6 }
  0xc9   : > { %v493_v23 = vmul.f32 %v2101_v54, %v380_v20 }
  0xca   : > { %v784_v21 = vpack.c.bf16 %v758_v19, %v757_v18 }
  0xcb   : > { %v531_v25 = vadd.f32 %v2112_v60, %v493_v23  ;;  %v613_v28 = vpop.permute.xlu0 %612 }
  0xcc   : > { %v390_v22 = vpop.permute.xlu1 %389  ;;  %1820 = vmatmul.mubr.msk.bf16.gmra.mxu0 %vm818_vm0, %v784_v21  ;;  %v698_v34 = vmul.f32 %v2107_v58, %v613_v28  ;;  %v1949_v28 = vld [vmem:[%s2467_s3 + $0x18] sm:$0xff]  }
  0xcd   : > { %v727_v30 = vadd.f32 %v695_v26, %v531_v25  ;;  %v495_v32 = vmul.f32 %v2101_v54, %v390_v22  ;;  %v502_v26 = vmul.f32 %v2101_v54, %v2098_v51  ;;  %1843 = vmatprep.subr.bf16.mxu1 %v1949_v28 }
  0xcf   : > { %v759_v36 = vmax.f32 %v727_v30, 0.0  ;;  %v533_v38 = vadd.f32 %v2112_v60, %v495_v32  ;;  %v617_v53 = vpop.permute.xlu0 %616 }
  0xd0   : > { %v395_v24 = vpop.permute.xlu1 %394  ;;  %v699_v59 = vmul.f32 %v2107_v58, %v617_v53 }
  0xd1   : > { %v496_v27 = vmul.f32 %v2101_v54, %v395_v24 }
  0xd3   : > { %v534_v33 = vadd.f32 %v2112_v60, %v496_v27  ;;  %v629_v1 = vpop.permute.xlu0 %628 }
  0xd4   : > { %v702_v4 = vmul.f32 %v2107_v58, %v629_v1 }
  0xd5   : > { %v605_v31 = vpop.permute.xlu1 %604  ;;  %v730_v39 = vadd.f32 %v698_v34, %v534_v33 }
  0xd6   : > { %v696_v35 = vmul.f32 %v2107_v58, %v605_v31  ;;  %v540_v31 = vadd.f32 %v2112_v60, %v502_v26 }
  0xd7   : > { %v762_v46 = vmax.f32 %v730_v39, 0.0  ;;  %v633_v6 = vpop.permute.xlu0 %632 }
  0xd8   : > { %v728_v44 = vadd.f32 %v696_v35, %v532_v29  ;;  %v703_v15 = vmul.f32 %v2107_v58, %v633_v6 }
  0xd9   : > { %v609_v37 = vpop.permute.xlu1 %608 }
  0xda   : > { %v760_v40 = vmax.f32 %v728_v44, 0.0  ;;  %v697_v42 = vmul.f32 %v2107_v58, %v609_v37 }
  0xdb   : > { %v645_v35 = vpop.permute.xlu0 %644 }
  0xdc   : > { %v785_v43 = vpack.c.bf16 %v760_v40, %v759_v36  ;;  %v729_v45 = vadd.f32 %v697_v42, %v533_v38  ;;  %v706_v51 = vmul.f32 %v2107_v58, %v645_v35  ;;  %v1950_v36 = vld [vmem:[%s2467_s3 + $0x10] sm:$0xff]  }
  0xde   : > { %v761_v48 = vmax.f32 %v729_v45, 0.0  ;;  %v400_v49 = vpop.permute.xlu1 %399  ;;  %1823 = vmatprep.mubr.msk.bf16.mxu0 %vm818_vm0, %v785_v43 }
  0xdf   : > { %v497_v41 = vmul.f32 %v2101_v54, %v400_v49  ;;  %v649_v57 = vpop.permute.xlu0 %648 }
  0xe0   : > { %v786_v50 = vpack.c.bf16 %v762_v46, %v761_v48 }
  0xe1   : > { %v535_v61 = vadd.f32 %v2112_v60, %v497_v41 }
  0xe2   : > { %v410_v52 = vpop.permute.xlu1 %409  ;;  %1824 = vmatmul.mubr.msk.bf16.gmra.mxu0 %vm818_vm0, %v786_v50 }
  0xe3   : > { %v499_v2 = vmul.f32 %v2101_v54, %v410_v52  ;;  %v731_v8 = vadd.f32 %v699_v59, %v535_v61  ;;  %v506_v61 = vmul.f32 %v2101_v54, %v2103_v55 }
  0xe5   : > { %v537_v9 = vadd.f32 %v2112_v60, %v499_v2  ;;  %v763_v14 = vmax.f32 %v731_v8, 0.0  ;;  %v661_v8 = vpop.permute.xlu0 %660 }
  0xe6   : > { %v415_v56 = vpop.permute.xlu1 %414 }
  0xe7   : > { %v500_v63 = vmul.f32 %v2101_v54, %v415_v56 }
  0xe9   : > { %v538_v5 = vadd.f32 %v2112_v60, %v500_v63  ;;  %v665_v6 = vpop.permute.xlu0 %664 }
  0xeb   : > { %v621_v3 = vpop.permute.xlu1 %620  ;;  %v734_v11 = vadd.f32 %v702_v4, %v538_v5 }
  0xec   : > { %v700_v7 = vmul.f32 %v2107_v58, %v621_v3  ;;  %v544_v3 = vadd.f32 %v2112_v60, %v506_v61 }
  0xed   : > { %v766_v18 = vmax.f32 %v734_v11, 0.0 }
  0xee   : > { %v732_v47 = vadd.f32 %v700_v7, %v536_v0  ;;  %v707_v0 = vmul.f32 %v2107_v58, %v649_v57 }
  0xef   : > { %v625_v10 = vpop.permute.xlu1 %624 }
  0xf0   : > { %v764_v12 = vmax.f32 %v732_v47, 0.0  ;;  %v701_v13 = vmul.f32 %v2107_v58, %v625_v10  ;;  %v710_v47 = vmul.f32 %v2107_v58, %v661_v8 }
  0xf2   : > { %v733_v16 = vadd.f32 %v701_v13, %v537_v9  ;;  %v787_v17 = vpack.c.bf16 %v764_v12, %v763_v14 }
  0xf4   : > { %v765_v19 = vmax.f32 %v733_v16, 0.0  ;;  %v420_v20 = vpop.permute.xlu1 %419  ;;  %1827 = vmatprep.mubr.msk.bf16.mxu1 %vm818_vm0, %v787_v17 }
  0xf5   : > { %v501_v23 = vmul.f32 %v2101_v54, %v420_v20 }
  0xf6   : > { %v788_v21 = vpack.c.bf16 %v766_v18, %v765_v19 }
  0xf7   : > { %v539_v25 = vadd.f32 %v2112_v60, %v501_v23 }
  0xf8   : > { %v430_v22 = vpop.permute.xlu1 %429  ;;  %1828 = vmatmul.mubr.msk.bf16.vlgmr.msra.gmra.mxu1 %vm818_vm0, %v788_v21 }
  0xf9   : > { %v735_v29 = vadd.f32 %v703_v15, %v539_v25  ;;  %v503_v32 = vmul.f32 %v2101_v54, %v430_v22  ;;  %1844 = vmatpush3.bf16.msra.mxu1 %v1949_v28  ;;  %v510_v25 = vmul.f32 %v2101_v54, %v2115_v62  ;;  %v677_v28 = vpop.permute.xlu0 %676 }
  0xfa   : > { %1845 = vmatprep.subr.bf16.mxu1 %v1950_v36  ;;  %v714_v35 = vmul.f32 %v2107_v58, %v677_v28 }
  0xfb   : > { %v767_v37 = vmax.f32 %v735_v29, 0.0  ;;  %v541_v39 = vadd.f32 %v2112_v60, %v503_v32 }
  0xfc   : > { %v435_v24 = vpop.permute.xlu1 %434 }
  0xfd   : > { %v504_v27 = vmul.f32 %v2101_v54, %v435_v24  ;;  %1846 = vmatpush3.bf16.msra.mxu1 %v1950_v36 }
  0xff   : > { %v542_v33 = vadd.f32 %v2112_v60, %v504_v27  ;;  %v711_v27 = vmul.f32 %v2107_v58, %v665_v6 }
 0x101   : > { %v637_v30 = vpop.permute.xlu1 %636  ;;  %v738_v40 = vadd.f32 %v706_v51, %v542_v33 }
 0x102   : > { %v704_v34 = vmul.f32 %v2107_v58, %v637_v30 }
 0x103   : > { %v770_v48 = vmax.f32 %v738_v40, 0.0 }
 0x104   : > { %v736_v44 = vadd.f32 %v704_v34, %v540_v31  ;;  %v548_v31 = vadd.f32 %v2112_v60, %v510_v25 }
 0x105   : > { %v641_v38 = vpop.permute.xlu1 %640 }
 0x106   : > { %v768_v42 = vmax.f32 %v736_v44, 0.0  ;;  %v705_v43 = vmul.f32 %v2107_v58, %v641_v38 }
 0x108   : > { %v789_v45 = vpack.c.bf16 %v768_v42, %v767_v37  ;;  %v737_v46 = vadd.f32 %v705_v43, %v541_v39 }
 0x10a   : > { %v769_v49 = vmax.f32 %v737_v46, 0.0  ;;  %v440_v50 = vpop.permute.xlu1 %439  ;;  %1831 = vmatprep.mubr.msk.bf16.mxu1 %vm818_vm0, %v789_v45 }
 0x10b   : > { %v505_v53 = vmul.f32 %v2101_v54, %v440_v50 }
 0x10c   : > { %v790_v52 = vpack.c.bf16 %v770_v48, %v769_v49  ;;  %v2244_v49 = vld [vmem:[%s2468_s4] ss:$0 sm:$0xff] }
 0x10d   : > { %v543_v59 = vadd.f32 %v2112_v60, %v505_v53 }
 0x10e   : > { %v450_v41 = vpop.permute.xlu1 %449  ;;  %1832 = vmatmul.mubr.msk.bf16.gmra.mxu1 %vm818_vm0, %v790_v52 }
 0x10f   : > { %v739_v1 = vadd.f32 %v707_v0, %v543_v59  ;;  %v507_v4 = vmul.f32 %v2101_v54, %v450_v41 }
 0x111   : > { %v771_v10 = vmax.f32 %v739_v1, 0.0  ;;  %v545_v11 = vadd.f32 %v2112_v60, %v507_v4 }
 0x112   : > { %v455_v56 = vpop.permute.xlu1 %454 }
 0x113   : > { %v508_v63 = vmul.f32 %v2101_v54, %v455_v56 }
 0x115   : > { %v546_v5 = vadd.f32 %v2112_v60, %v508_v63 }
 0x117   : > { %v653_v2 = vpop.permute.xlu1 %652  ;;  %v742_v12 = vadd.f32 %v710_v47, %v546_v5 }
 0x118   : > { %v708_v7 = vmul.f32 %v2107_v58, %v653_v2 }
 0x119   : > { %v774_v18 = vmax.f32 %v742_v12, 0.0 }
 0x11a   : > { %v740_v9 = vadd.f32 %v708_v7, %v544_v3 }
 0x11b   : > { %v657_v55 = vpop.permute.xlu1 %656 }
 0x11c   : > { %v772_v13 = vmax.f32 %v740_v9, 0.0  ;;  %v709_v14 = vmul.f32 %v2107_v58, %v657_v55 }
 0x11e   : > { %v791_v16 = vpack.c.bf16 %v772_v13, %v771_v10  ;;  %v741_v17 = vadd.f32 %v709_v14, %v545_v11 }
 0x120   : > { %v773_v19 = vmax.f32 %v741_v17, 0.0  ;;  %v460_v20 = vpop.permute.xlu1 %459  ;;  %1835 = vmatprep.mubr.msk.bf16.mxu1 %vm818_vm0, %v791_v16 }
 0x121   : > { %v509_v23 = vmul.f32 %v2101_v54, %v460_v20 }
 0x122   : > { %v792_v21 = vpack.c.bf16 %v774_v18, %v773_v19 }
 0x123   : > { %v547_v15 = vadd.f32 %v2112_v60, %v509_v23 }
 0x124   : > { %v470_v22 = vpop.permute.xlu1 %469  ;;  %1836 = vmatmul.mubr.msk.bf16.gmra.mxu1 %vm818_vm0, %v792_v21 }
 0x125   : > { %v743_v29 = vadd.f32 %v711_v27, %v547_v15  ;;  %v511_v32 = vmul.f32 %v2101_v54, %v470_v22 }
 0x127   : > { %v775_v44 = vmax.f32 %v743_v29, 0.0  ;;  %v549_v36 = vadd.f32 %v2112_v60, %v511_v32 }
 0x128   : > { %v475_v24 = vpop.permute.xlu1 %474 }
 0x129   : > { %v512_v26 = vmul.f32 %v2101_v54, %v475_v24 }
 0x12b   : > { %v550_v33 = vadd.f32 %v2112_v60, %v512_v26 }
 0x12d   : > { %v669_v30 = vpop.permute.xlu1 %668  ;;  %v746_v37 = vadd.f32 %v714_v35, %v550_v33 }
 0x12e   : > { %v712_v34 = vmul.f32 %v2107_v58, %v669_v30 }
 0x12f   : > { %v778_v43 = vmax.f32 %v746_v37, 0.0 }
 0x130   : > { %v744_v51 = vadd.f32 %v712_v34, %v548_v31 }
 0x131   : > { %v673_v62 = vpop.permute.xlu1 %672 }
 0x132   : > { %v776_v38 = vmax.f32 %v744_v51, 0.0  ;;  %v713_v39 = vmul.f32 %v2107_v58, %v673_v62 }
 0x134   : > { %v793_v40 = vpack.c.bf16 %v776_v38, %v775_v44  ;;  %v745_v42 = vadd.f32 %v713_v39, %v549_v36 }
 0x136   : > { %v777_v45 = vmax.f32 %v745_v42, 0.0  ;;  %1839 = vmatprep.mubr.msk.bf16.mxu1 %vm818_vm0, %v793_v40 }
 0x138   : > { %v794_v54 = vpack.c.bf16 %v778_v43, %v777_v45 }
 0x13a   : > { %1840 = vmatmul.mubr.msk.bf16.gmra.mxu1 %vm818_vm0, %v794_v54 }
 0x17c   : > { %v1813_v46 = vpop.f32.mrf.mxu0 }
 0x17d   : > { %v910_v52 = vadd.f32 %v1813_v46, %v2244_v49 }
 0x17e   : > { %v901_v48 = vpop.f32.mrf.mxu0 }
 0x17f   : > { %v902_v50 = vadd.f32 %v2244_v49, %v901_v48  ;;  %v1030_v63 = vmax.f32 %v910_v52, 0.0 }
 0x180   : > { %v1814_v60 = vpop.f32.mrf.mxu0 }
 0x181   : > { %v913_v58 = vadd.f32 %v1814_v60, %v2244_v49  ;;  %v1028_v59 = vmax.f32 %v902_v50, 0.0 }
 0x182   : > { %v904_v41 = vpop.f32.mrf.mxu0 }
 0x183   : > { %v905_v53 = vadd.f32 %v2244_v49, %v904_v41  ;;  %v1031_v56 = vmax.f32 %v913_v58, 0.0 }
 0x184   : > { %v1817_v57 = vpop.f32.mrf.mxu0 }
 0x185   : > { %v1029_v61 = vmax.f32 %v905_v53, 0.0  ;;  %v1061_v2 = vpack.c.bf16 %v1031_v56, %v1030_v63  ;;  %v926_v7 = vadd.f32 %v1817_v57, %v2244_v49  ;;  %v1951_v56 = vld [vmem:[%s2469_s5 + $0x8] sm:$0xff]  }
 0x186   : > { %v917_v0 = vpop.f32.mrf.mxu0  ;;  %1879 = vmatprep.subr.bf16.mxu0 %v1951_v56 }
 0x187   : > { %v1060_v1 = vpack.c.bf16 %v1029_v61, %v1028_v59  ;;  %v918_v4 = vadd.f32 %v2244_v49, %v917_v0  ;;  %v1034_v12 = vmax.f32 %v926_v7, 0.0  ;;  %1880 = vmatpush3.bf16.msra.mxu0 %v1951_v56  ;;  %v1952_v61 = vld [vmem:[%s2469_s5] sm:$0xff]  }
 0x188   : > { %v1818_v3 = vpop.f32.mrf.mxu0  ;;  %1881 = vmatprep.subr.bf16.mxu0 %v1952_v61 }
 0x189   : > { %v929_v5 = vadd.f32 %v1818_v3, %v2244_v49  ;;  %1847 = vmatprep.mubr.msk.bf16.mxu1 %vm818_vm0, %v1060_v1  ;;  %v1032_v55 = vmax.f32 %v918_v4, 0.0 }
 0x18a   : > { %v920_v8 = vpop.f32.mrf.mxu0  ;;  %1848 = vmatmul.mubr.msk.bf16.vlgmr.msra.gmra.mxu1 %vm818_vm0, %v1061_v2 }
 0x18b   : > { %v921_v47 = vadd.f32 %v2244_v49, %v920_v8  ;;  %v1035_v9 = vmax.f32 %v929_v5, 0.0  ;;  %1882 = vmatpush3.bf16.msra.mxu0 %v1952_v61 }
 0x18c   : > { %v1821_v10 = vpop.f32.mrf.mxu0 }
 0x18d   : > { %v1033_v11 = vmax.f32 %v921_v47, 0.0  ;;  %v1063_v16 = vpack.c.bf16 %v1035_v9, %v1034_v12  ;;  %v942_v20 = vadd.f32 %v1821_v10, %v2244_v49 }
 0x18e   : > { %v933_v13 = vpop.f32.mrf.mxu0 }
 0x18f   : > { %v1062_v14 = vpack.c.bf16 %v1033_v11, %v1032_v55  ;;  %v934_v18 = vadd.f32 %v2244_v49, %v933_v13  ;;  %v1038_v15 = vmax.f32 %v942_v20, 0.0 }
 0x190   : > { %v1822_v17 = vpop.f32.mrf.mxu0 }
 0x191   : > { %v945_v19 = vadd.f32 %v1822_v17, %v2244_v49  ;;  %1851 = vmatprep.mubr.msk.bf16.mxu1 %vm818_vm0, %v1062_v14  ;;  %v1036_v6 = vmax.f32 %v934_v18, 0.0 }
 0x192   : > { %v936_v21 = vpop.f32.mrf.mxu0  ;;  %1852 = vmatmul.mubr.msk.bf16.gmra.mxu1 %vm818_vm0, %v1063_v16 }
 0x193   : > { %v937_v22 = vadd.f32 %v2244_v49, %v936_v21  ;;  %v1039_v23 = vmax.f32 %v945_v19, 0.0 }
 0x195   : > { %v1037_v24 = vmax.f32 %v937_v22, 0.0  ;;  %v1065_v26 = vpack.c.bf16 %v1039_v23, %v1038_v15 }
 0x197   : > { %v1064_v25 = vpack.c.bf16 %v1037_v24, %v1036_v6 }
 0x199   : > { %1855 = vmatprep.mubr.msk.bf16.mxu1 %vm818_vm0, %v1064_v25 }
 0x19a   : > { %1856 = vmatmul.mubr.msk.bf16.gmra.mxu1 %vm818_vm0, %v1065_v26 }
 0x1a2   : > { %v1825_v27 = vpop.f32.mrf.mxu0 }
 0x1a3   : > { %v958_v32 = vadd.f32 %v1825_v27, %v2244_v49 }
 0x1a4   : > { %v949_v28 = vpop.f32.mrf.mxu0 }
 0x1a5   : > { %v950_v30 = vadd.f32 %v2244_v49, %v949_v28  ;;  %v1042_v62 = vmax.f32 %v958_v32, 0.0 }
 0x1a6   : > { %v1826_v29 = vpop.f32.mrf.mxu0 }
 0x1a7   : > { %v961_v31 = vadd.f32 %v1826_v29, %v2244_v49  ;;  %v1040_v51 = vmax.f32 %v950_v30, 0.0 }
 0x1a8   : > { %v952_v33 = vpop.f32.mrf.mxu0 }
 0x1a9   : > { %v953_v34 = vadd.f32 %v2244_v49, %v952_v33  ;;  %v1043_v35 = vmax.f32 %v961_v31, 0.0 }
 0x1ab   : > { %v1041_v44 = vmax.f32 %v953_v34, 0.0  ;;  %v1067_v37 = vpack.c.bf16 %v1043_v35, %v1042_v62  ;;  %v2303_v62 = vld [vmem:[%s2468_s4 + $0x1] ss:$0 sm:$0xff] }
 0x1ad   : > { %v1066_v36 = vpack.c.bf16 %v1041_v44, %v1040_v51 }
 0x1af   : > { %1859 = vmatprep.mubr.msk.bf16.mxu1 %vm818_vm0, %v1066_v36 }
 0x1b0   : > { %1860 = vmatmul.mubr.msk.bf16.gmra.mxu1 %vm818_vm0, %v1067_v37 }
 0x1b8   : > { %v1829_v38 = vpop.f32.mrf.mxu1 }
 0x1b9   : > { %v974_v45 = vadd.f32 %v1829_v38, %v2244_v49 }
 0x1ba   : > { %v965_v39 = vpop.f32.mrf.mxu1 }
 0x1bb   : > { %v966_v42 = vadd.f32 %v2244_v49, %v965_v39  ;;  %v1046_v58 = vmax.f32 %v974_v45, 0.0 }
 0x1bc   : > { %v1830_v40 = vpop.f32.mrf.mxu1 }
 0x1bd   : > { %v977_v43 = vadd.f32 %v1830_v40, %v2244_v49  ;;  %v1044_v60 = vmax.f32 %v966_v42, 0.0 }
 0x1be   : > { %v968_v54 = vpop.f32.mrf.mxu1 }
 0x1bf   : > { %v969_v46 = vadd.f32 %v2244_v49, %v968_v54  ;;  %v1047_v48 = vmax.f32 %v977_v43, 0.0 }
 0x1c1   : > { %v1045_v50 = vmax.f32 %v969_v46, 0.0  ;;  %v1069_v41 = vpack.c.bf16 %v1047_v48, %v1046_v58 }
 0x1c3   : > { %v1068_v52 = vpack.c.bf16 %v1045_v50, %v1044_v60 }
 0x1c5   : > { %1863 = vmatprep.mubr.msk.bf16.mxu1 %vm818_vm0, %v1068_v52 }
 0x1c6   : > { %1864 = vmatmul.mubr.msk.bf16.gmra.mxu1 %vm818_vm0, %v1069_v41 }
 0x1ce   : > { %v1833_v53 = vpop.f32.mrf.mxu1 }
 0x1cf   : > { %v990_v1 = vadd.f32 %v1833_v53, %v2244_v49 }
 0x1d0   : > { %v981_v57 = vpop.f32.mrf.mxu1 }
 0x1d1   : > { %v982_v63 = vadd.f32 %v2244_v49, %v981_v57  ;;  %v1050_v8 = vmax.f32 %v990_v1, 0.0 }
 0x1d2   : > { %v1834_v59 = vpop.f32.mrf.mxu1 }
 0x1d3   : > { %v993_v0 = vadd.f32 %v1834_v59, %v2244_v49  ;;  %v1048_v5 = vmax.f32 %v982_v63, 0.0 }
 0x1d4   : > { %v984_v2 = vpop.f32.mrf.mxu1 }
 0x1d5   : > { %v985_v3 = vadd.f32 %v2244_v49, %v984_v2  ;;  %v1051_v4 = vmax.f32 %v993_v0, 0.0 }
 0x1d7   : > { %v1049_v7 = vmax.f32 %v985_v3, 0.0  ;;  %v1071_v9 = vpack.c.bf16 %v1051_v4, %v1050_v8 }
 0x1d9   : > { %v1070_v47 = vpack.c.bf16 %v1049_v7, %v1048_v5 }
 0x1db   : > { %1867 = vmatprep.mubr.msk.bf16.mxu1 %vm818_vm0, %v1070_v47 }
 0x1dc   : > { %1868 = vmatmul.mubr.msk.bf16.gmra.mxu1 %vm818_vm0, %v1071_v9 }
 0x1e4   : > { %v1837_v10 = vpop.f32.mrf.mxu1 }
 0x1e5   : > { %v1006_v14 = vadd.f32 %v1837_v10, %v2244_v49 }
 0x1e6   : > { %v997_v55 = vpop.f32.mrf.mxu1 }
 0x1e7   : > { %v998_v12 = vadd.f32 %v2244_v49, %v997_v55  ;;  %v1054_v21 = vmax.f32 %v1006_v14, 0.0 }
 0x1e8   : > { %v1838_v11 = vpop.f32.mrf.mxu1 }
 0x1e9   : > { %v1009_v13 = vadd.f32 %v1838_v11, %v2244_v49  ;;  %v1052_v19 = vmax.f32 %v998_v12, 0.0 }
 0x1ea   : > { %v1000_v16 = vpop.f32.mrf.mxu1 }
 0x1eb   : > { %v1001_v17 = vadd.f32 %v2244_v49, %v1000_v16  ;;  %v1055_v18 = vmax.f32 %v1009_v13, 0.0 }
 0x1ed   : > { %v1053_v20 = vmax.f32 %v1001_v17, 0.0  ;;  %v1073_v23 = vpack.c.bf16 %v1055_v18, %v1054_v21 }
 0x1ef   : > { %v1072_v22 = vpack.c.bf16 %v1053_v20, %v1052_v19 }
 0x1f1   : > { %1871 = vmatprep.mubr.msk.bf16.mxu1 %vm818_vm0, %v1072_v22 }
 0x1f2   : > { %1872 = vmatmul.mubr.msk.bf16.gmra.mxu1 %vm818_vm0, %v1073_v23 }
 0x1fa   : > { %v1841_v6 = vpop.f32.mrf.mxu1 }
 0x1fb   : > { %v1022_v27 = vadd.f32 %v1841_v6, %v2244_v49 }
 0x1fc   : > { %v1013_v24 = vpop.f32.mrf.mxu1 }
 0x1fd   : > { %v1014_v25 = vadd.f32 %v2244_v49, %v1013_v24  ;;  %v1058_v33 = vmax.f32 %v1022_v27, 0.0 }
 0x1fe   : > { %v1842_v15 = vpop.f32.mrf.mxu1 }
 0x1ff   : > { %v1025_v26 = vadd.f32 %v1842_v15, %v2244_v49  ;;  %v1056_v31 = vmax.f32 %v1014_v25, 0.0 }
 0x200   : > { %v1016_v28 = vpop.f32.mrf.mxu1 }
 0x201   : > { %v1017_v29 = vadd.f32 %v2244_v49, %v1016_v28  ;;  %v1059_v30 = vmax.f32 %v1025_v26, 0.0 }
 0x203   : > { %v1057_v32 = vmax.f32 %v1017_v29, 0.0  ;;  %v1075_v35 = vpack.c.bf16 %v1059_v30, %v1058_v33 }
 0x205   : > { %v1074_v34 = vpack.c.bf16 %v1057_v32, %v1056_v31 }
 0x207   : > { %1875 = vmatprep.mubr.msk.bf16.mxu1 %vm818_vm0, %v1074_v34 }
 0x208   : > { %1876 = vmatmul.mubr.msk.bf16.gmra.mxu1 %vm818_vm0, %v1075_v35 }
 0x24a   : > { %v1849_v51 = vpop.f32.mrf.mxu1 }
 0x24b   : > { %v1192_v38 = vadd.f32 %v1849_v51, %v2303_v62 }
 0x24c   : > { %v1183_v44 = vpop.f32.mrf.mxu1 }
 0x24d   : > { %v1184_v49 = vadd.f32 %v2303_v62, %v1183_v44  ;;  %v1312_v46 = vmax.f32 %v1192_v38, 0.0 }
 0x24e   : > { %v1850_v36 = vpop.f32.mrf.mxu1 }
 0x24f   : > { %v1195_v37 = vadd.f32 %v1850_v36, %v2303_v62  ;;  %v1310_v45 = vmax.f32 %v1184_v49, 0.0 }
 0x250   : > { %v1186_v39 = vpop.f32.mrf.mxu1 }
 0x251   : > { %v1187_v40 = vadd.f32 %v2303_v62, %v1186_v39  ;;  %v1313_v42 = vmax.f32 %v1195_v37, 0.0 }
 0x252   : > { %v1853_v43 = vpop.f32.mrf.mxu1 }
 0x253   : > { %v1311_v54 = vmax.f32 %v1187_v40, 0.0  ;;  %v1343_v50 = vpack.c.bf16 %v1313_v42, %v1312_v46  ;;  %v1208_v53 = vadd.f32 %v1853_v43, %v2303_v62 }
 0x254   : > { %v1199_v48 = vpop.f32.mrf.mxu1 }
 0x255   : > { %v1342_v60 = vpack.c.bf16 %v1311_v54, %v1310_v45  ;;  %v1200_v52 = vadd.f32 %v2303_v62, %v1199_v48  ;;  %v1316_v1 = vmax.f32 %v1208_v53, 0.0 }
 0x256   : > { %v1854_v58 = vpop.f32.mrf.mxu1 }
 0x257   : > { %v1211_v41 = vadd.f32 %v1854_v58, %v2303_v62  ;;  %1883 = vmatprep.mubr.msk.bf16.mxu0 %vm818_vm0, %v1342_v60  ;;  %v1314_v63 = vmax.f32 %v1200_v52, 0.0 }
 0x258   : > { %v1202_v56 = vpop.f32.mrf.mxu1  ;;  %1884 = vmatmul.mubr.msk.bf16.vlgmr.msra.gmra.mxu0 %vm818_vm0, %v1343_v50 }
 0x259   : > { %v1203_v57 = vadd.f32 %v2303_v62, %v1202_v56  ;;  %v1317_v59 = vmax.f32 %v1211_v41, 0.0 }
 0x25a   : > { %v1857_v61 = vpop.f32.mrf.mxu1 }
 0x25b   : > { %v1315_v0 = vmax.f32 %v1203_v57, 0.0  ;;  %v1345_v4 = vpack.c.bf16 %v1317_v59, %v1316_v1  ;;  %v1224_v47 = vadd.f32 %v1857_v61, %v2303_v62 }
 0x25c   : > { %v1215_v2 = vpop.f32.mrf.mxu1 }
 0x25d   : > { %v1344_v3 = vpack.c.bf16 %v1315_v0, %v1314_v63  ;;  %v1216_v7 = vadd.f32 %v2303_v62, %v1215_v2  ;;  %v1320_v13 = vmax.f32 %v1224_v47, 0.0 }
 0x25e   : > { %v1858_v5 = vpop.f32.mrf.mxu1 }
 0x25f   : > { %v1227_v8 = vadd.f32 %v1858_v5, %v2303_v62  ;;  %1887 = vmatprep.mubr.msk.bf16.mxu0 %vm818_vm0, %v1344_v3  ;;  %v1318_v11 = vmax.f32 %v1216_v7, 0.0 }
 0x260   : > { %v1218_v9 = vpop.f32.mrf.mxu1  ;;  %1888 = vmatmul.mubr.msk.bf16.gmra.mxu0 %vm818_vm0, %v1345_v4 }
 0x261   : > { %v1219_v10 = vadd.f32 %v2303_v62, %v1218_v9  ;;  %v1321_v55 = vmax.f32 %v1227_v8, 0.0 }
 0x263   : > { %v1319_v12 = vmax.f32 %v1219_v10, 0.0  ;;  %v1347_v16 = vpack.c.bf16 %v1321_v55, %v1320_v13 }
 0x265   : > { %v1346_v14 = vpack.c.bf16 %v1319_v12, %v1318_v11 }
 0x267   : > { %1891 = vmatprep.mubr.msk.bf16.mxu0 %vm818_vm0, %v1346_v14 }
 0x268   : > { %1892 = vmatmul.mubr.msk.bf16.gmra.mxu0 %vm818_vm0, %v1347_v16 }
 0x270   : > { %v1861_v17 = vpop.f32.mrf.mxu1 }
 0x271   : > { %v1240_v22 = vadd.f32 %v1861_v17, %v2303_v62 }
 0x272   : > { %v1231_v18 = vpop.f32.mrf.mxu1 }
 0x273   : > { %v1232_v20 = vadd.f32 %v2303_v62, %v1231_v18  ;;  %v1324_v26 = vmax.f32 %v1240_v22, 0.0 }
 0x274   : > { %v1862_v19 = vpop.f32.mrf.mxu1 }
 0x275   : > { %v1243_v21 = vadd.f32 %v1862_v19, %v2303_v62  ;;  %v1322_v15 = vmax.f32 %v1232_v20, 0.0 }
 0x276   : > { %v1234_v23 = vpop.f32.mrf.mxu1 }
 0x277   : > { %v1235_v6 = vadd.f32 %v2303_v62, %v1234_v23  ;;  %v1325_v24 = vmax.f32 %v1243_v21, 0.0 }
 0x279   : > { %v1323_v25 = vmax.f32 %v1235_v6, 0.0  ;;  %v1349_v28 = vpack.c.bf16 %v1325_v24, %v1324_v26  ;;  %v2356_v6 = vld [vmem:[%s2470_s6] ss:$0 sm:$0xff] }
 0x27b   : > { %v1348_v27 = vpack.c.bf16 %v1323_v25, %v1322_v15 }
 0x27d   : > { %1895 = vmatprep.mubr.msk.bf16.mxu0 %vm818_vm0, %v1348_v27 }
 0x27e   : > { %1896 = vmatmul.mubr.msk.bf16.gmra.mxu0 %vm818_vm0, %v1349_v28 }
 0x286   : > { %v1865_v29 = vpop.f32.mrf.mxu1 }
 0x287   : > { %v1256_v34 = vadd.f32 %v1865_v29, %v2303_v62 }
 0x288   : > { %v1247_v30 = vpop.f32.mrf.mxu1 }
 0x289   : > { %v1248_v32 = vadd.f32 %v2303_v62, %v1247_v30  ;;  %v1328_v37 = vmax.f32 %v1256_v34, 0.0 }
 0x28a   : > { %v1866_v31 = vpop.f32.mrf.mxu1 }
 0x28b   : > { %v1259_v33 = vadd.f32 %v1866_v31, %v2303_v62  ;;  %v1326_v36 = vmax.f32 %v1248_v32, 0.0 }
 0x28c   : > { %v1250_v35 = vpop.f32.mrf.mxu1 }
 0x28d   : > { %v1251_v51 = vadd.f32 %v2303_v62, %v1250_v35  ;;  %v1329_v44 = vmax.f32 %v1259_v33, 0.0 }
 0x28f   : > { %v1327_v49 = vmax.f32 %v1251_v51, 0.0  ;;  %v1351_v39 = vpack.c.bf16 %v1329_v44, %v1328_v37 }
 0x291   : > { %v1350_v38 = vpack.c.bf16 %v1327_v49, %v1326_v36 }
 0x293   : > { %1899 = vmatprep.mubr.msk.bf16.mxu0 %vm818_vm0, %v1350_v38 }
 0x294   : > { %1900 = vmatmul.mubr.msk.bf16.gmra.mxu0 %vm818_vm0, %v1351_v39 }
 0x29c   : > { %v1869_v40 = vpop.f32.mrf.mxu1 }
 0x29d   : > { %v1272_v46 = vadd.f32 %v1869_v40, %v2303_v62 }
 0x29e   : > { %v1263_v42 = vpop.f32.mrf.mxu1 }
 0x29f   : > { %v1264_v45 = vadd.f32 %v2303_v62, %v1263_v42  ;;  %v1332_v41 = vmax.f32 %v1272_v46, 0.0 }
 0x2a0   : > { %v1870_v43 = vpop.f32.mrf.mxu1 }
 0x2a1   : > { %v1275_v54 = vadd.f32 %v1870_v43, %v2303_v62  ;;  %v1330_v58 = vmax.f32 %v1264_v45, 0.0 }
 0x2a2   : > { %v1266_v48 = vpop.f32.mrf.mxu1 }
 0x2a3   : > { %v1267_v60 = vadd.f32 %v2303_v62, %v1266_v48  ;;  %v1333_v50 = vmax.f32 %v1275_v54, 0.0 }
 0x2a5   : > { %v1331_v52 = vmax.f32 %v1267_v60, 0.0  ;;  %v1353_v56 = vpack.c.bf16 %v1333_v50, %v1332_v41 }
 0x2a7   : > { %v1352_v53 = vpack.c.bf16 %v1331_v52, %v1330_v58 }
 0x2a9   : > { %1903 = vmatprep.mubr.msk.bf16.mxu0 %vm818_vm0, %v1352_v53 }
 0x2aa   : > { %1904 = vmatmul.mubr.msk.bf16.gmra.mxu0 %vm818_vm0, %v1353_v56 }
 0x2b2   : > { %v1873_v57 = vpop.f32.mrf.mxu1 }
 0x2b3   : > { %v1288_v1 = vadd.f32 %v1873_v57, %v2303_v62 }
 0x2b4   : > { %v1279_v59 = vpop.f32.mrf.mxu1 }
 0x2b5   : > { %v1280_v63 = vadd.f32 %v2303_v62, %v1279_v59  ;;  %v1336_v8 = vmax.f32 %v1288_v1, 0.0 }
 0x2b6   : > { %v1874_v61 = vpop.f32.mrf.mxu1 }
 0x2b7   : > { %v1291_v0 = vadd.f32 %v1874_v61, %v2303_v62  ;;  %v1334_v5 = vmax.f32 %v1280_v63, 0.0 }
 0x2b8   : > { %v1282_v2 = vpop.f32.mrf.mxu1 }
 0x2b9   : > { %v1283_v3 = vadd.f32 %v2303_v62, %v1282_v2  ;;  %v1337_v4 = vmax.f32 %v1291_v0, 0.0 }
 0x2bb   : > { %v1335_v7 = vmax.f32 %v1283_v3, 0.0  ;;  %v1355_v9 = vpack.c.bf16 %v1337_v4, %v1336_v8 }
 0x2bd   : > { %v1354_v47 = vpack.c.bf16 %v1335_v7, %v1334_v5 }
 0x2bf   : > { %1907 = vmatprep.mubr.msk.bf16.mxu0 %vm818_vm0, %v1354_v47 }
 0x2c0   : > { %1908 = vmatmul.mubr.msk.bf16.gmra.mxu0 %vm818_vm0, %v1355_v9 }
 0x2c8   : > { %v1877_v10 = vpop.f32.mrf.mxu1 }
 0x2c9   : > { %v1304_v14 = vadd.f32 %v1877_v10, %v2303_v62 }
 0x2ca   : > { %v1295_v55 = vpop.f32.mrf.mxu1 }
 0x2cb   : > { %v1296_v12 = vadd.f32 %v2303_v62, %v1295_v55  ;;  %v1340_v21 = vmax.f32 %v1304_v14, 0.0 }
 0x2cc   : > { %v1878_v11 = vpop.f32.mrf.mxu1 }
 0x2cd   : > { %v1307_v13 = vadd.f32 %v1878_v11, %v2303_v62  ;;  %v1338_v19 = vmax.f32 %v1296_v12, 0.0 }
 0x2ce   : > { %v1298_v16 = vpop.f32.mrf.mxu1 }
 0x2cf   : > { %v1299_v17 = vadd.f32 %v2303_v62, %v1298_v16  ;;  %v1341_v18 = vmax.f32 %v1307_v13, 0.0 }
 0x2d1   : > { %v1339_v20 = vmax.f32 %v1299_v17, 0.0  ;;  %v1357_v23 = vpack.c.bf16 %v1341_v18, %v1340_v21 }
 0x2d3   : > { %v1356_v22 = vpack.c.bf16 %v1339_v20, %v1338_v19 }
 0x2d5   : > { %1911 = vmatprep.mubr.msk.bf16.mxu0 %vm818_vm0, %v1356_v22 }
 0x2d6   : > { %1912 = vmatmul.mubr.msk.bf16.gmra.mxu0 %vm818_vm0, %v1357_v23 }
 0x318   : > { %v1885_v62 = vpop.f32.mrf.mxu0 }
 0x319   : > { %v1472_v24 = vadd.f32 %v1885_v62, %v2356_v6 }
 0x31a   : > { %v1463_v15 = vpop.f32.mrf.mxu0 }
 0x31b   : > { %1593 = vst.msk [vmem:[%s2363_s12 + $0x10] sm:$0xff] %vm1590_vm1, %v1472_v24  ;;  %v1464_v25 = vadd.f32 %v2356_v6, %v1463_v15 }
 0x31c   : > { %v1886_v26 = vpop.f32.mrf.mxu0 }
 0x31d   : > { %1591 = vst.msk [vmem:[%s2363_s12] sm:$0xff] %vm1590_vm1, %v1464_v25  ;;  %v1475_v27 = vadd.f32 %v1886_v26, %v2356_v6 }
 0x31e   : > { %v1466_v28 = vpop.f32.mrf.mxu0 }
 0x31f   : > { %1594 = vst.msk [vmem:[%s2363_s12 + $0x18] sm:$0xff] %vm1590_vm1, %v1475_v27  ;;  %v1467_v29 = vadd.f32 %v2356_v6, %v1466_v28 }
 0x320   : > { %v1889_v30 = vpop.f32.mrf.mxu0 }
 0x321   : > { %1592 = vst.msk [vmem:[%s2363_s12 + $0x8] sm:$0xff] %vm1590_vm1, %v1467_v29  ;;  %v1488_v31 = vadd.f32 %v1889_v30, %v2356_v6 }
 0x322   : > { %v1479_v32 = vpop.f32.mrf.mxu0 }
 0x323   : > { %1597 = vst.msk [vmem:[%s2363_s12 + $0x30] sm:$0xff] %vm1590_vm1, %v1488_v31  ;;  %v1480_v33 = vadd.f32 %v2356_v6, %v1479_v32 }
 0x324   : > { %v1890_v34 = vpop.f32.mrf.mxu0 }
 0x325   : > { %1595 = vst.msk [vmem:[%s2363_s12 + $0x20] sm:$0xff] %vm1590_vm1, %v1480_v33  ;;  %v1491_v35 = vadd.f32 %v1890_v34, %v2356_v6 }
 0x326   : > { %v1482_v51 = vpop.f32.mrf.mxu0 }
 0x327   : > { %1598 = vst.msk [vmem:[%s2363_s12 + $0x38] sm:$0xff] %vm1590_vm1, %v1491_v35  ;;  %v1483_v44 = vadd.f32 %v2356_v6, %v1482_v51 }
 0x328   : > { %v1893_v36 = vpop.f32.mrf.mxu0 }
 0x329   : > { %1596 = vst.msk [vmem:[%s2363_s12 + $0x28] sm:$0xff] %vm1590_vm1, %v1483_v44  ;;  %v1504_v49 = vadd.f32 %v1893_v36, %v2356_v6 }
 0x32a   : > { %v1495_v37 = vpop.f32.mrf.mxu0 }
 0x32b   : > { %1601 = vst.msk [vmem:[%s2363_s12 + $0x50] sm:$0xff] %vm1590_vm1, %v1504_v49  ;;  %v1496_v38 = vadd.f32 %v2356_v6, %v1495_v37 }
 0x32c   : > { %v1894_v39 = vpop.f32.mrf.mxu0 }
 0x32d   : > { %1599 = vst.msk [vmem:[%s2363_s12 + $0x40] sm:$0xff] %vm1590_vm1, %v1496_v38  ;;  %v1507_v40 = vadd.f32 %v1894_v39, %v2356_v6 }
 0x32e   : > { %v1498_v42 = vpop.f32.mrf.mxu0 }
 0x32f   : > { %1602 = vst.msk [vmem:[%s2363_s12 + $0x58] sm:$0xff] %vm1590_vm1, %v1507_v40  ;;  %v1499_v43 = vadd.f32 %v2356_v6, %v1498_v42 }
 0x331   : > { %1600 = vst.msk [vmem:[%s2363_s12 + $0x48] sm:$0xff] %vm1590_vm1, %v1499_v43 }
 0x33e   : > { %v1897_v45 = vpop.f32.mrf.mxu0 }
 0x33f   : > { %v1520_v54 = vadd.f32 %v1897_v45, %v2356_v6 }
 0x340   : > { %v1511_v46 = vpop.f32.mrf.mxu0 }
 0x341   : > { %1605 = vst.msk [vmem:[%s2363_s12 + $0x70] sm:$0xff] %vm1590_vm1, %v1520_v54  ;;  %v1512_v48 = vadd.f32 %v2356_v6, %v1511_v46 }
 0x342   : > { %v1898_v60 = vpop.f32.mrf.mxu0 }
 0x343   : > { %1603 = vst.msk [vmem:[%s2363_s12 + $0x60] sm:$0xff] %vm1590_vm1, %v1512_v48  ;;  %v1523_v50 = vadd.f32 %v1898_v60, %v2356_v6 }
 0x344   : > { %v1514_v58 = vpop.f32.mrf.mxu0 }
 0x345   : > { %1606 = vst.msk [vmem:[%s2363_s12 + $0x78] sm:$0xff] %vm1590_vm1, %v1523_v50  ;;  %v1515_v52 = vadd.f32 %v2356_v6, %v1514_v58 }
 0x347   : > { %1604 = vst.msk [vmem:[%s2363_s12 + $0x68] sm:$0xff] %vm1590_vm1, %v1515_v52 }
 0x354   : > { %v1901_v41 = vpop.f32.mrf.mxu0 }
 0x355   : > { %v1536_v53 = vadd.f32 %v1901_v41, %v2356_v6 }
 0x356   : > { %v1527_v56 = vpop.f32.mrf.mxu0 }
 0x357   : > { %1609 = vst.msk [vmem:[%s2363_s12 + $0x90] sm:$0xff] %vm1590_vm1, %v1536_v53  ;;  %v1528_v57 = vadd.f32 %v2356_v6, %v1527_v56 }
 0x358   : > { %v1902_v59 = vpop.f32.mrf.mxu0 }
 0x359   : > { %1607 = vst.msk [vmem:[%s2363_s12 + $0x80] sm:$0xff] %vm1590_vm1, %v1528_v57  ;;  %v1539_v61 = vadd.f32 %v1902_v59, %v2356_v6 }
 0x35a   : > { %v1530_v63 = vpop.f32.mrf.mxu0 }
 0x35b   : > { %1610 = vst.msk [vmem:[%s2363_s12 + $0x98] sm:$0xff] %vm1590_vm1, %v1539_v61  ;;  %v1531_v0 = vadd.f32 %v2356_v6, %v1530_v63 }
 0x35d   : > { %1608 = vst.msk [vmem:[%s2363_s12 + $0x88] sm:$0xff] %vm1590_vm1, %v1531_v0 }
 0x36a   : > { %v1905_v1 = vpop.f32.mrf.mxu0 }
 0x36b   : > { %v1552_v2 = vadd.f32 %v1905_v1, %v2356_v6 }
 0x36c   : > { %v1543_v3 = vpop.f32.mrf.mxu0 }
 0x36d   : > { %1613 = vst.msk [vmem:[%s2363_s12 + $0xb0] sm:$0xff] %vm1590_vm1, %v1552_v2  ;;  %v1544_v4 = vadd.f32 %v2356_v6, %v1543_v3 }
 0x36e   : > { %v1906_v5 = vpop.f32.mrf.mxu0 }
 0x36f   : > { %1611 = vst.msk [vmem:[%s2363_s12 + $0xa0] sm:$0xff] %vm1590_vm1, %v1544_v4  ;;  %v1555_v7 = vadd.f32 %v1906_v5, %v2356_v6 }
 0x370   : > { %v1546_v8 = vpop.f32.mrf.mxu0 }
 0x371   : > { %1614 = vst.msk [vmem:[%s2363_s12 + $0xb8] sm:$0xff] %vm1590_vm1, %v1555_v7  ;;  %v1547_v47 = vadd.f32 %v2356_v6, %v1546_v8 }
 0x373   : > { %1612 = vst.msk [vmem:[%s2363_s12 + $0xa8] sm:$0xff] %vm1590_vm1, %v1547_v47 }
 0x380   : > { %v1909_v9 = vpop.f32.mrf.mxu0 }
 0x381   : > { %v1568_v10 = vadd.f32 %v1909_v9, %v2356_v6 }
 0x382   : > { %v1559_v55 = vpop.f32.mrf.mxu0 }
 0x383   : > { %1617 = vst.msk [vmem:[%s2363_s12 + $0xd0] sm:$0xff] %vm1590_vm1, %v1568_v10  ;;  %v1560_v11 = vadd.f32 %v2356_v6, %v1559_v55 }
 0x384   : > { %v1910_v12 = vpop.f32.mrf.mxu0 }
 0x385   : > { %1615 = vst.msk [vmem:[%s2363_s12 + $0xc0] sm:$0xff] %vm1590_vm1, %v1560_v11  ;;  %v1571_v13 = vadd.f32 %v1910_v12, %v2356_v6 }
 0x386   : > { %v1562_v14 = vpop.f32.mrf.mxu0 }
 0x387   : > { %1618 = vst.msk [vmem:[%s2363_s12 + $0xd8] sm:$0xff] %vm1590_vm1, %v1571_v13  ;;  %v1563_v16 = vadd.f32 %v2356_v6, %v1562_v14 }
 0x389   : > { %1616 = vst.msk [vmem:[%s2363_s12 + $0xc8] sm:$0xff] %vm1590_vm1, %v1563_v16 }
 0x396   : > { %v1913_v17 = vpop.f32.mrf.mxu0 }
 0x397   : > { %v1584_v18 = vadd.f32 %v1913_v17, %v2356_v6 }
 0x398   : > { %v1575_v19 = vpop.f32.mrf.mxu0 }
 0x399   : > { %1621 = vst.msk [vmem:[%s2363_s12 + $0xf0] sm:$0xff] %vm1590_vm1, %v1584_v18  ;;  %v1576_v20 = vadd.f32 %v2356_v6, %v1575_v19 }
 0x39a   : > { %v1914_v21 = vpop.f32.mrf.mxu0 }
 0x39b   : > { %1619 = vst.msk [vmem:[%s2363_s12 + $0xe0] sm:$0xff] %vm1590_vm1, %v1576_v20  ;;  %v1587_v22 = vadd.f32 %v1914_v21, %v2356_v6 }
 0x39c   : > { %v1578_v23 = vpop.f32.mrf.mxu0 }
 0x39d   : > { %1622 = vst.msk [vmem:[%s2363_s12 + $0xf8] sm:$0xff] %vm1590_vm1, %v1587_v22  ;;  %v1579_v62 = vadd.f32 %v2356_v6, %v1578_v23 }
 0x39f   : > { %1620 = vst.msk [vmem:[%s2363_s12 + $0xe8] sm:$0xff] %vm1590_vm1, %v1579_v62 }
 0x3a0 PF: > { %s17_s24 = sadd.s32 1, %s1959_s24  }
 0x3a1   : > { %p14_p4 = scmp.ge.s32.totalorder %s17_s24, 4  }
 0x3a3   :  { %16 = sbr.rel (!%p14_p4) target bundleno = 1 (0x1), region = 80 }

</bundles_post_ra>
